<compile_context>
chip_gen: v5e
topology: v5e:2x2
jax: 0.10.0
libtpu: 0.0.40
codegen_flags: <defaults>
</compile_context>

<pallas_src>
import functools
import math

import jax
import jax.numpy as jnp
from jax import lax
from jax.experimental import pallas as pl
from jax.experimental.pallas import tpu as pltpu


# --------------------------- hardware / tiling helpers ------------------------

def _round_up(x, m):
    return (x + m - 1) // m * m


@functools.lru_cache(maxsize=1)
def _tpu_generation():
    try:
        kind = jax.devices()[0].device_kind.lower()
    except Exception:
        return None
    for g in (7, 6, 5, 4, 3, 2):
        if f"v{g}" in kind:
            return g
    return None


def _hw_config():
    """Per-generation scoped-VMEM limit, per-kernel tile budget, MXU dtype."""
    gen = _tpu_generation()
    if gen is not None and gen >= 7:
        # v7x: 64 MiB physical VMEM (32 MiB default scoped), bf16 MXU, no int.
        return dict(vmem_limit=48 << 20, budget=24 << 20,
                    compute_dtype=jnp.bfloat16, tkv_target=256, tk_target=256)
    if gen == 6:
        # v6e: 128 MiB VMEM, bf16-native MXU/VPU/EUP.
        return dict(vmem_limit=96 << 20, budget=48 << 20,
                    compute_dtype=jnp.bfloat16, tkv_target=512, tk_target=512)
    if gen == 5:
        # v5e/v5p: 128 MiB VMEM but 16 MiB default scoped limit; no bf16
        # VPU/EUP -> keep f32 activations by default.
        return dict(vmem_limit=96 << 20, budget=48 << 20,
                    compute_dtype=jnp.float32, tkv_target=512, tk_target=512)
    # v4 and unknown generations: conservative defaults.
    return dict(vmem_limit=None, budget=12 << 20,
                compute_dtype=jnp.float32, tkv_target=256, tk_target=256)


def _divisor_tile(dim, target, align):
    """Largest tile <= target that divides `dim` and is a multiple of `align`;
    falls back to the full dimension (always a legal block shape)."""
    t = (min(target, dim) // align) * align
    while t >= align:
        if dim % t == 0:
            return t
        t -= align
    return dim


def _head_group(num_heads, d_k):
    """Heads processed per grid step: the smallest group whose lane width is a
    multiple of 128 (aligned, unmasked stores); falls back to all heads
    (group width == d_model, also a legal full-dim block)."""
    for cand in range(1, num_heads):
        if num_heads % cand == 0 and (cand * d_k) % 128 == 0:
            return cand
    return num_heads


def _attn_weights_tq(sq8, skv, gw, hg, isz, osz, budget, target=256):
    """Cap tq so *all* double-buffered blocks of the weights kernel
    (Q, K, V, O and the (hg, tq, Skv) weights block) fit `budget`."""
    fixed = 2 * 2 * skv * gw * isz                      # K + V blocks, 2x buffered
    per_tq = 2 * gw * (isz + osz) + 2 * hg * skv * 4    # Q + O + weights per q-row
    avail = budget - fixed
    if avail <= per_tq * 8:
        # TODO(synk): K/V alone exceed the budget; needs a kv grid axis with a
        # two-pass / blockwise softmax for the weights-producing path.
        cap = 8
    else:
        cap = (avail // per_tq) // 8 * 8
    return max(8, min(target, cap, sq8) // 8 * 8)


def _flash_tiles(sq8, skv, gw, hg, d_k, isz, osz, budget, tq_target, tkv_target):
    """Pick (tq, tkv) for the flash kernel so double-buffered Q/K/V/O blocks
    plus the m/l/acc scratch fit `budget`.  tkv always divides Skv."""
    tkv_cands = [t for t in range(8, min(tkv_target, skv) + 1, 8) if skv % t == 0]
    tkv_cands = tkv_cands[::-1]
    if not tkv_cands:
        # TODO(synk): masked edge kv tiles for Skv that is not a multiple of 8.
        tkv_cands = [skv]
    tq = max(8, min(tq_target, sq8) // 8 * 8)

    def vmem(tq_, tkv_):
        return (2 * tq_ * gw * (isz + osz)        # Q + O blocks, double-buffered
                + 4 * tkv_ * gw * isz             # K + V blocks, double-buffered
                + hg * tq_ * (d_k + 2) * 4)       # m/l/acc f32 scratch

    tkv = tkv_cands[0]
    for cand in tkv_cands:
        tkv = cand
        if vmem(tq, tkv) <= budget:
            break
    while vmem(tq, tkv) > budget and tq > 8:
        tq = max(8, (tq // 2) // 8 * 8)
    return tq, tkv


# ------------------------------ tiled linear kernel ---------------------------

def _linear_kernel(x_ref, w_ref, b_ref, o_ref, acc_ref):
    k = pl.program_id(2)

    @pl.when(k == 0)
    def _():
        acc_ref[...] = jnp.zeros_like(acc_ref)

    # Inputs were cast to the MXU compute dtype in the wrapper; accumulate f32.
    acc_ref[...] += jnp.dot(x_ref[...], w_ref[...],
                            preferred_element_type=jnp.float32)

    @pl.when(k == pl.num_programs(2) - 1)
    def _():
        o_ref[...] = (acc_ref[...] + b_ref[...]).astype(o_ref.dtype)


def pallas_linear(x, w, b, *, out_dtype=None, hw=None,
                  tm_target=256, tn_target=256, tk_target=None):
    """y = x @ w + b with x:(M, Din), w:(Din, Dout), b:(Dout,) f32."""
    hw = hw or _hw_config()
    tk_target = tk_target or hw["tk_target"]
    M, Din = x.shape
    Dout = w.shape[1]
    out_dtype = out_dtype or x.dtype

    tn = _divisor_tile(Dout, tn_target, 128)
    tk = _divisor_tile(Din, tk_target, 128)
    tm = max(8, min(tm_target, _round_up(M, 8)) // 8 * 8)
    Mp = _round_up(M, tm)
    if Mp != M:                                   # pad rows, slice back below
        x = jnp.pad(x, ((0, Mp - M), (0, 0)))

    isz = jnp.dtype(x.dtype).itemsize
    cost = pl.CostEstimate(
        flops=2 * Mp * Din * Dout, transcendentals=0,
        bytes_accessed=isz * (Mp * Din + Din * Dout) + 4 * Dout
        + jnp.dtype(out_dtype).itemsize * Mp * Dout)

    y = pl.pallas_call(
        _linear_kernel,
        out_shape=jax.ShapeDtypeStruct((Mp, Dout), out_dtype),
        grid=(Mp // tm, Dout // tn, Din // tk),
        in_specs=[
            pl.BlockSpec((tm, tk), lambda i, j, k: (i, k)),
            pl.BlockSpec((tk, tn), lambda i, j, k: (k, j)),
            pl.BlockSpec((1, tn), lambda i, j, k: (0, j)),
        ],
        out_specs=pl.BlockSpec((tm, tn), lambda i, j, k: (i, j)),
        scratch_shapes=[pltpu.VMEM((tm, tn), jnp.float32)],
        compiler_params=pltpu.CompilerParams(
            dimension_semantics=("parallel", "parallel", "arbitrary"),
            vmem_limit_bytes=hw["vmem_limit"]),
        cost_estimate=cost,
    )(x, w, b.reshape(1, Dout).astype(jnp.float32))
    return y[:M] if Mp != M else y


# --------------------- fused QKV projection (3 outputs) -----------------------

def _qkv_linear_kernel(x_ref, wq_ref, wk_ref, wv_ref, bq_ref, bk_ref, bv_ref,
                       q_ref, k_ref, v_ref, accq, acck, accv):
    kk = pl.program_id(2)

    @pl.when(kk == 0)
    def _():
        accq[...] = jnp.zeros_like(accq)
        acck[...] = jnp.zeros_like(acck)
        accv[...] = jnp.zeros_like(accv)

    x = x_ref[...]                                 # loaded once, used 3x
    accq[...] += jnp.dot(x, wq_ref[...], preferred_element_type=jnp.float32)
    acck[...] += jnp.dot(x, wk_ref[...], preferred_element_type=jnp.float32)
    accv[...] += jnp.dot(x, wv_ref[...], preferred_element_type=jnp.float32)

    @pl.when(kk == pl.num_programs(2) - 1)
    def _():
        q_ref[...] = (accq[...] + bq_ref[...]).astype(q_ref.dtype)
        k_ref[...] = (acck[...] + bk_ref[...]).astype(k_ref.dtype)
        v_ref[...] = (accv[...] + bv_ref[...]).astype(v_ref.dtype)


def pallas_qkv_linear(x, wq, wk, wv, bq, bk, bv, *, out_dtype=None, hw=None,
                      tm_target=256, tn_target=256, tk_target=None):
    """Self-attention fused projection: reads x once per output tile and
    emits q, k, v as three (M, Dout) arrays (no host-side slicing)."""
    hw = hw or _hw_config()
    tk_target = tk_target or hw["tk_target"]
    M, Din = x.shape
    Dout = wq.shape[1]
    out_dtype = out_dtype or x.dtype

    tn = _divisor_tile(Dout, tn_target, 128)
    tk = _divisor_tile(Din, tk_target, 128)
    tm = max(8, min(tm_target, _round_up(M, 8)) // 8 * 8)
    Mp = _round_up(M, tm)
    if Mp != M:
        x = jnp.pad(x, ((0, Mp - M), (0, 0)))

    isz = jnp.dtype(x.dtype).itemsize
    cost = pl.CostEstimate(
        flops=6 * Mp * Din * Dout, transcendentals=0,
        bytes_accessed=isz * (Mp * Din + 3 * Din * Dout)
        + 3 * jnp.dtype(out_dtype).itemsize * Mp * Dout)

    w_spec = pl.BlockSpec((tk, tn), lambda i, j, k: (k, j))
    b_spec = pl.BlockSpec((1, tn), lambda i, j, k: (0, j))
    o_spec = pl.BlockSpec((tm, tn), lambda i, j, k: (i, j))

    q, k, v = pl.pallas_call(
        _qkv_linear_kernel,
        out_shape=tuple(jax.ShapeDtypeStruct((Mp, Dout), out_dtype)
                        for _ in range(3)),
        grid=(Mp // tm, Dout // tn, Din // tk),
        in_specs=[
            pl.BlockSpec((tm, tk), lambda i, j, k: (i, k)),
            w_spec, w_spec, w_spec, b_spec, b_spec, b_spec,
        ],
        out_specs=(o_spec, o_spec, o_spec),
        scratch_shapes=[pltpu.VMEM((tm, tn), jnp.float32) for _ in range(3)],
        compiler_params=pltpu.CompilerParams(
            dimension_semantics=("parallel", "parallel", "arbitrary"),
            vmem_limit_bytes=hw["vmem_limit"]),
        cost_estimate=cost,
    )(x, wq, wk, wv,
      bq.reshape(1, Dout).astype(jnp.float32),
      bk.reshape(1, Dout).astype(jnp.float32),
      bv.reshape(1, Dout).astype(jnp.float32))
    if Mp != M:
        q, k, v = q[:M], k[:M], v[:M]
    return q, k, v


# ---------------- attention kernel that also returns the weights --------------
# (needed to match the PyTorch module's second return value)

def _attn_weights_kernel(q_ref, k_ref, v_ref, o_ref, w_ref, *, hg, d_k,
                         compute_dtype):
    for h in range(hg):                     # static loop over the head *group*
        lo, hi = h * d_k, (h + 1) * d_k
        qh = q_ref[0, :, lo:hi]             # (tq, d_k); 1/sqrt(d_k) pre-folded
        kh = k_ref[0, :, lo:hi]             # (Skv, d_k)
        vh = v_ref[0, :, lo:hi]             # (Skv, d_k)

        # Contract last dims directly: no k.T relayout; f32 scores/softmax.
        s = lax.dot_general(qh, kh, (((1,), (1,)), ((), ())),
                            preferred_element_type=jnp.float32)   # (tq, Skv)
        m = jnp.max(s, axis=-1, keepdims=True)
        e = jnp.exp(s - m)
        l = jnp.sum(e, axis=-1, keepdims=True)
        p = e * pl.reciprocal(l, approx=False)   # exact: weights are returned

        w_ref[0, h] = p                                           # lane-dense Skv
        oh = jnp.dot(p.astype(compute_dtype), vh,
                     preferred_element_type=jnp.float32)
        if d_k % 128 == 0:
            # Aligned, unmasked per-head store: no (tq, gw) concat/spill.
            o_ref[0, :, lo:hi] = oh.astype(o_ref.dtype)
        else:
            # Small group (gw <= 128 or == d_model): concat within the group.
            if h == 0:
                outs = []
            outs.append(oh)
            if h == hg - 1:
                o_ref[0] = jnp.concatenate(outs, axis=-1).astype(o_ref.dtype)


def pallas_attention_with_weights(q, k, v, num_heads, *, compute_dtype=None,
                                  hw=None):
    """Scaled dot-product attention (scale pre-folded into q projection).
    Returns (out (B,Sq,D), weights (B,H,Sq,Skv))."""
    B, Sq, D = q.shape
    Skv = k.shape[1]
    d_k = D // num_heads
    hw = hw or _hw_config()
    compute_dtype = compute_dtype or q.dtype
    hg = _head_group(num_heads, d_k)
    gw = hg * d_k
    G = num_heads // hg
    isz = jnp.dtype(q.dtype).itemsize

    tq = _attn_weights_tq(_round_up(Sq, 8), Skv, gw, hg, isz, isz, hw["budget"])
    Sq_p = _round_up(Sq, tq)
    if Sq_p != Sq:
        q = jnp.pad(q, ((0, 0), (0, Sq_p - Sq), (0, 0)))

    cost = pl.CostEstimate(
        flops=4 * B * Sq_p * Skv * D,
        transcendentals=B * num_heads * Sq_p * Skv,
        bytes_accessed=isz * (2 * B * Sq_p * D + 2 * B * Skv * D)
        + 4 * B * num_heads * Sq_p * Skv)

    kernel = functools.partial(_attn_weights_kernel, hg=hg, d_k=d_k,
                               compute_dtype=compute_dtype)
    out, w = pl.pallas_call(
        kernel,
        out_shape=(jax.ShapeDtypeStruct((B, Sq_p, D), q.dtype),
                   jax.ShapeDtypeStruct((B, num_heads, Sq_p, Skv), jnp.float32)),
        grid=(B, G, Sq_p // tq),
        in_specs=[
            pl.BlockSpec((1, tq, gw), lambda b, g, i: (b, i, g)),
            pl.BlockSpec((1, Skv, gw), lambda b, g, i: (b, 0, g)),
            pl.BlockSpec((1, Skv, gw), lambda b, g, i: (b, 0, g)),
        ],
        out_specs=(
            pl.BlockSpec((1, tq, gw), lambda b, g, i: (b, i, g)),
            pl.BlockSpec((1, hg, tq, Skv), lambda b, g, i: (b, g, i, 0)),
        ),
        compiler_params=pltpu.CompilerParams(
            dimension_semantics=("parallel", "parallel", "parallel"),
            vmem_limit_bytes=hw["vmem_limit"]),
        cost_estimate=cost,
    )(q, k, v)
    if Sq_p != Sq:
        out = out[:, :Sq]
        w = w[:, :, :Sq]
    return out, w


# ------------------- flash-style attention (no weights output) ----------------

def _flash_attn_kernel(q_ref, k_ref, v_ref, o_ref, m_sc, l_sc, acc_sc, *,
                       hg, d_k, compute_dtype):
    kv = pl.program_id(3)

    @pl.when(kv == 0)
    def _():
        m_sc[...] = jnp.full(m_sc.shape, -jnp.inf, dtype=m_sc.dtype)
        l_sc[...] = jnp.zeros(l_sc.shape, dtype=l_sc.dtype)
        acc_sc[...] = jnp.zeros(acc_sc.shape, dtype=acc_sc.dtype)

    for h in range(hg):                     # static loop over the head *group*
        lo, hi = h * d_k, (h + 1) * d_k
        qh = q_ref[0, :, lo:hi]             # (tq, d_k); scale pre-folded
        kh = k_ref[0, :, lo:hi]             # (tkv, d_k)
        vh = v_ref[0, :, lo:hi]             # (tkv, d_k)

        s = lax.dot_general(qh, kh, (((1,), (1,)), ((), ())),
                            preferred_element_type=jnp.float32)   # (tq, tkv)
        m_prev = m_sc[h]
        m_new = jnp.maximum(m_prev, jnp.max(s, axis=-1, keepdims=True))
        alpha = jnp.exp(m_prev - m_new)
        p = jnp.exp(s - m_new)
        l_sc[h] = alpha * l_sc[h] + jnp.sum(p, axis=-1, keepdims=True)
        acc_sc[h] = alpha * acc_sc[h] + jnp.dot(
            p.astype(compute_dtype), vh, preferred_element_type=jnp.float32)
        m_sc[h] = m_new

    @pl.when(kv == pl.num_programs(3) - 1)
    def _():
        if d_k % 128 == 0:
            for h in range(hg):
                o_ref[0, :, h * d_k:(h + 1) * d_k] = (
                    acc_sc[h] * pl.reciprocal(l_sc[h], approx=True)
                ).astype(o_ref.dtype)
        else:
            outs = [acc_sc[h] * pl.reciprocal(l_sc[h], approx=True)
                    for h in range(hg)]
            o_ref[0] = jnp.concatenate(outs, axis=-1).astype(o_ref.dtype)


def pallas_attention_flash(q, k, v, num_heads, *, compute_dtype=None, hw=None,
                           tq_target=256):
    """Attention output only: online softmax, no O(S^2) weights in HBM."""
    B, Sq, D = q.shape
    Skv = k.shape[1]
    d_k = D // num_heads
    hw = hw or _hw_config()
    compute_dtype = compute_dtype or q.dtype
    hg = _head_group(num_heads, d_k)
    gw = hg * d_k
    G = num_heads // hg
    isz = jnp.dtype(q.dtype).itemsize

    tq, tkv = _flash_tiles(_round_up(Sq, 8), Skv, gw, hg, d_k, isz, isz,
                           hw["budget"], tq_target, hw["tkv_target"])
    Sq_p = _round_up(Sq, tq)
    if Sq_p != Sq:
        q = jnp.pad(q, ((0, 0), (0, Sq_p - Sq), (0, 0)))

    cost = pl.CostEstimate(
        flops=4 * B * Sq_p * Skv * D,
        transcendentals=B * num_heads * Sq_p * Skv,
        bytes_accessed=isz * (2 * B * Sq_p * D + 2 * B * Skv * D))

    kernel = functools.partial(_flash_attn_kernel, hg=hg, d_k=d_k,
                               compute_dtype=compute_dtype)
    out = pl.pallas_call(
        kernel,
        out_shape=jax.ShapeDtypeStruct((B, Sq_p, D), q.dtype),
        grid=(B, G, Sq_p // tq, Skv // tkv),
        in_specs=[
            pl.BlockSpec((1, tq, gw), lambda b, g, i, j: (b, i, g)),
            pl.BlockSpec((1, tkv, gw), lambda b, g, i, j: (b, j, g)),
            pl.BlockSpec((1, tkv, gw), lambda b, g, i, j: (b, j, g)),
        ],
        out_specs=pl.BlockSpec((1, tq, gw), lambda b, g, i, j: (b, i, g)),
        scratch_shapes=[
            pltpu.VMEM((hg, tq, 1), jnp.float32),
            pltpu.VMEM((hg, tq, 1), jnp.float32),
            pltpu.VMEM((hg, tq, d_k), jnp.float32),
        ],
        compiler_params=pltpu.CompilerParams(
            dimension_semantics=("parallel", "parallel", "parallel", "arbitrary"),
            vmem_limit_bytes=hw["vmem_limit"]),
        cost_estimate=cost,
    )(q, k, v)
    return out[:, :Sq] if Sq_p != Sq else out


# ------------------------------ module-level wrapper ---------------------------

def init_params(key, d_model):
    """Deterministic init for the four Linear(d_model, d_model) layers."""
    keys = jax.random.split(key, 8)
    lim = 1.0 / (d_model ** 0.5)

    def lin(wk, bk):
        w = jax.random.uniform(wk, (d_model, d_model), jnp.float32, -lim, lim)
        b = jax.random.uniform(bk, (d_model,), jnp.float32, -lim, lim)
        return w, b

    return {"q": lin(keys[0], keys[1]), "k": lin(keys[2], keys[3]),
            "v": lin(keys[4], keys[5]), "out": lin(keys[6], keys[7])}


def multi_head_attention(params, q, k, v, num_heads, *, mask=None,
                         return_weights=True, compute_dtype=None,
                         is_self_attention=None):
    """Forward pass matching MultiHeadAttention.forward (mask=None path).

    PERF NOTE: return_weights=True matches the PyTorch module (second return
    value) but writes B*H*Sq*Skv f32 to HBM; pass return_weights=False to use
    the flash path whenever the attention weights are not consumed.
    """
    assert mask is None  # TODO(synk): optional mask not implemented.
    B, Sq, D = q.shape
    Skv = k.shape[1]
    if D % num_heads != 0:
        raise ValueError("d_model must be divisible by num_heads")
    d_k = D // num_heads
    in_dtype = q.dtype

    hw = _hw_config()
    cd = compute_dtype if compute_dtype is not None else hw["compute_dtype"]

    wq, bq = params["q"]
    wk, bk = params["k"]
    wv, bv = params["v"]
    wo, bo = params["out"]
    # Fold 1/sqrt(d_k) into the q projection (one-time O(D^2) fold; removes a
    # per-tile VPU multiply from the attention kernels).
    scale = 1.0 / math.sqrt(d_k)
    wq = wq * scale
    bq = bq * scale

    if is_self_attention is None:
        # NOTE: object-identity never fires under jax.jit (each arg gets its
        # own tracer); pass is_self_attention=True explicitly in jitted code.
        is_self_attention = (q is k) and (k is v)

    # Cast activations/weights to the MXU compute dtype once, in the wrapper
    # (halves HBM + DMA bytes when cd is bf16); f32 accumulation in-kernel.
    if is_self_attention:
        qh, kh, vh = pallas_qkv_linear(
            q.reshape(B * Sq, D).astype(cd),
            wq.astype(cd), wk.astype(cd), wv.astype(cd), bq, bk, bv,
            out_dtype=cd, hw=hw)
        qh = qh.reshape(B, Sq, D)
        kh = kh.reshape(B, Sq, D)
        vh = vh.reshape(B, Sq, D)
    else:
        qh = pallas_linear(q.reshape(B * Sq, D).astype(cd), wq.astype(cd), bq,
                           out_dtype=cd, hw=hw).reshape(B, Sq, D)
        kh = pallas_linear(k.reshape(B * Skv, D).astype(cd), wk.astype(cd), bk,
                           out_dtype=cd, hw=hw).reshape(B, Skv, D)
        vh = pallas_linear(v.reshape(B * Skv, D).astype(cd), wv.astype(cd), bv,
                           out_dtype=cd, hw=hw).reshape(B, Skv, D)

    # Activations stay (B, S, D); heads are a grid axis inside the kernels.
    if return_weights:
        attn_out, attn_w = pallas_attention_with_weights(
            qh, kh, vh, num_heads, compute_dtype=cd, hw=hw)
    else:
        attn_out = pallas_attention_flash(
            qh, kh, vh, num_heads, compute_dtype=cd, hw=hw)
        attn_w = None

    out = pallas_linear(attn_out.reshape(B * Sq, D), wo.astype(cd), bo,
                        out_dtype=in_dtype, hw=hw).reshape(B, Sq, D)
    return out, attn_w


# ----------------------------------- main -------------------------------------

if __name__ == "__main__":
    def ref_forward(params, q, k, v, num_heads):
        D = q.shape[-1]
        d_k = D // num_heads
        hi = jax.lax.Precision.HIGHEST

        def proj(x, w, b):
            y = jnp.dot(x, w, precision=hi) + b
            return y.reshape(x.shape[0], -1, num_heads, d_k).transpose(0, 2, 1, 3)

        qh = proj(q, *params["q"])
        kh = proj(k, *params["k"])
        vh = proj(v, *params["v"])
        scores = jnp.einsum("bhqd,bhkd->bhqk", qh, kh, precision=hi) / (d_k ** 0.5)
        p = jax.nn.softmax(scores, axis=-1)
        o = jnp.einsum("bhqk,bhkd->bhqd", p, vh, precision=hi)
        o = o.transpose(0, 2, 1, 3).reshape(q.shape[0], -1, D)
        wo, bo = params["out"]
        return jnp.dot(o, wo, precision=hi) + bo, p

    # ---- config 1: grouped heads (d_k = 8 < 128) ----
    B, S, D, H = 2, 8, 32, 4
    key = jax.random.PRNGKey(0)
    kq, kk_, kv_, kp = jax.random.split(key, 4)
    q_in = jax.random.normal(kq, (B, S, D), jnp.float32)
    k_in = jax.random.normal(kk_, (B, S, D), jnp.float32)
    v_in = jax.random.normal(kv_, (B, S, D), jnp.float32)
    params = init_params(kp, D)
    ref_out, ref_w = ref_forward(params, q_in, k_in, v_in, H)

    # 1) cross-attention (separate projections) with weights, f32 compute.
    out, attn_w = multi_head_attention(params, q_in, k_in, v_in, H,
                                       compute_dtype=jnp.float32)
    jax.block_until_ready((out, attn_w))
    assert out.shape == (B, S, D) and attn_w.shape == (B, H, S, S)
    assert jnp.allclose(out, ref_out, atol=1e-4, rtol=1e-4), "output mismatch"
    assert jnp.allclose(attn_w, ref_w, atol=1e-4, rtol=1e-4), "weights mismatch"

    # 2) self-attention: fused 3-output QKV projection (explicit flag).
    out_sa, w_sa = multi_head_attention(params, q_in, q_in, q_in, H,
                                        compute_dtype=jnp.float32,
                                        is_self_attention=True)
    jax.block_until_ready((out_sa, w_sa))
    ref_sa, ref_w_sa = ref_forward(params, q_in, q_in, q_in, H)
    assert jnp.allclose(out_sa, ref_sa, atol=1e-4, rtol=1e-4), "fused-qkv output"
    assert jnp.allclose(w_sa, ref_w_sa, atol=1e-4, rtol=1e-4), "fused-qkv weights"

    # 3) flash path (no S^2 weights materialized).
    out_fl, none_w = multi_head_attention(params, q_in, k_in, v_in, H,
                                          compute_dtype=jnp.float32,
                                          return_weights=False)
    out_fl = jax.block_until_ready(out_fl)
    assert none_w is None
    assert jnp.allclose(out_fl, ref_out, atol=2e-3, rtol=2e-3), "flash output"

    # ---- config 2: d_k = 128 -> heads on the grid, aligned per-head stores ----
    B2, S2, D2, H2 = 1, 16, 256, 2
    k2x, k2p = jax.random.split(jax.random.PRNGKey(1), 2)
    x2 = jax.random.normal(k2x, (B2, S2, D2), jnp.float32)
    params2 = init_params(k2p, D2)
    ref2, ref2_w = ref_forward(params2, x2, x2, x2, H2)

    out2, w2 = multi_head_attention(params2, x2, x2, x2, H2,
                                    compute_dtype=jnp.float32)
    jax.block_until_ready((out2, w2))
    assert out2.shape == (B2, S2, D2) and w2.shape == (B2, H2, S2, S2)
    assert jnp.allclose(out2, ref2, atol=5e-4, rtol=5e-4), "head-grid output"
    assert jnp.allclose(w2, ref2_w, atol=5e-4, rtol=5e-4), "head-grid weights"

    out2f, _ = multi_head_attention(params2, x2, x2, x2, H2,
                                    compute_dtype=jnp.float32,
                                    return_weights=False)
    jax.block_until_ready(out2f)
    assert jnp.allclose(out2f, ref2, atol=2e-3, rtol=2e-3), "head-grid flash"

    # 4) hardware-default compute dtype (bf16 on v6e/v7x): smoke check only.
    out_hw, w_hw = multi_head_attention(params, q_in, k_in, v_in, H)
    jax.block_until_ready((out_hw, w_hw))
    assert out_hw.shape == (B, S, D) and w_hw.shape == (B, H, S, S)
    assert bool(jnp.all(jnp.isfinite(out_hw))), "non-finite default-dtype output"
    assert float(jnp.max(jnp.abs(out_hw.astype(jnp.float32) - ref_out))) < 1.0

    print("KERNEL_OK")
</pallas_src>

<mosaic_0001>
module attributes {stable_mosaic.version = 11 : i64} {
  func.func @_linear_kernel(%arg0: i32, %arg1: i32, %arg2: i32, %arg3: memref<16x32xf32, #tpu.memory_space<vmem>>, %arg4: memref<32x32xf32, #tpu.memory_space<vmem>>, %arg5: memref<1x32xf32, #tpu.memory_space<vmem>>, %arg6: memref<16x32xf32, #tpu.memory_space<vmem>>, %arg7: memref<16x32xf32, #tpu.memory_space<vmem>>) attributes {dimension_semantics = [#tpu.dimension_semantics<parallel>, #tpu.dimension_semantics<parallel>, #tpu.dimension_semantics<arbitrary>], iteration_bounds = array<i64: 1, 1, 1>, scalar_prefetch = 0 : i64, scratch_operands = 1 : i64, tpu.core_type = #tpu.core_type<tc>, window_params = [{transform_indices = @transform_0, window_bounds = array<i64: 16, 32>}, {transform_indices = @transform_1, window_bounds = array<i64: 32, 32>}, {transform_indices = @transform_2, window_bounds = array<i64: 1, 32>}, {transform_indices = @transform_3, window_bounds = array<i64: 16, 32>}]} {
    %c0_i32 = arith.constant 0 : i32
    %0 = arith.cmpi eq, %arg2, %c0_i32 : i32
    %1 = arith.extui %0 : i1 to i32
    %c0_i32_0 = arith.constant 0 : i32
    %2 = arith.cmpi ne, %1, %c0_i32_0 : i32
    scf.if %2 {
      %cst_10 = arith.constant 0.000000e+00 : f32
      %12 = vector.broadcast %cst_10 : f32 to vector<16x32xf32>
      %c0_11 = arith.constant 0 : index
      %c0_12 = arith.constant 0 : index
      %13 = vector.load %arg7[%c0_11, %c0_12] : memref<16x32xf32, #tpu.memory_space<vmem>>, vector<16x32xf32>
      tpu.vector_store %arg7[%c0_11, %c0_12], %12 {strides = array<i32>} : memref<16x32xf32, #tpu.memory_space<vmem>>, vector<16x32xf32>,
    } else {
    }
    %c0 = arith.constant 0 : index
    %c0_1 = arith.constant 0 : index
    %3 = vector.load %arg7[%c0, %c0_1] : memref<16x32xf32, #tpu.memory_space<vmem>>, vector<16x32xf32>
    %c0_2 = arith.constant 0 : index
    %c0_3 = arith.constant 0 : index
    %4 = vector.load %arg3[%c0_2, %c0_3] : memref<16x32xf32, #tpu.memory_space<vmem>>, vector<16x32xf32>
    %c0_4 = arith.constant 0 : index
    %c0_5 = arith.constant 0 : index
    %5 = vector.load %arg4[%c0_4, %c0_5] : memref<32x32xf32, #tpu.memory_space<vmem>>, vector<32x32xf32>
    %cst = arith.constant dense<0.000000e+00> : vector<16x32xf32>
    %6 = tpu.matmul %4, %5, %cst {dimension_numbers = #tpu.dot_dimension_numbers<[1], [0], [0], [1], [0, 0, 1, 1], [], []>} : vector<16x32xf32>, vector<32x32xf32>, vector<16x32xf32> -> vector<16x32xf32>
    %7 = arith.addf %3, %6 : vector<16x32xf32>
    %c0_6 = arith.constant 0 : index
    %c0_7 = arith.constant 0 : index
    %8 = vector.load %arg7[%c0_6, %c0_7] : memref<16x32xf32, #tpu.memory_space<vmem>>, vector<16x32xf32>
    tpu.vector_store %arg7[%c0_6, %c0_7], %7 {strides = array<i32>} : memref<16x32xf32, #tpu.memory_space<vmem>>, vector<16x32xf32>,
    %c0_i32_8 = arith.constant 0 : i32
    %9 = arith.cmpi eq, %arg2, %c0_i32_8 : i32
    %10 = arith.extui %9 : i1 to i32
    %c0_i32_9 = arith.constant 0 : i32
    %11 = arith.cmpi ne, %10, %c0_i32_9 : i32
    scf.if %11 {
      %c0_10 = arith.constant 0 : index
      %c0_11 = arith.constant 0 : index
      %12 = vector.load %arg7[%c0_10, %c0_11] : memref<16x32xf32, #tpu.memory_space<vmem>>, vector<16x32xf32>
      %c0_12 = arith.constant 0 : index
      %c0_13 = arith.constant 0 : index
      %13 = vector.load %arg5[%c0_12, %c0_13] : memref<1x32xf32, #tpu.memory_space<vmem>>, vector<1x32xf32>
      %14 = vector.broadcast %13 : vector<1x32xf32> to vector<16x32xf32>
      %15 = arith.addf %12, %14 : vector<16x32xf32>
      %c0_14 = arith.constant 0 : index
      %c0_15 = arith.constant 0 : index
      %16 = vector.load %arg6[%c0_14, %c0_15] : memref<16x32xf32, #tpu.memory_space<vmem>>, vector<16x32xf32>
      tpu.vector_store %arg6[%c0_14, %c0_15], %15 {strides = array<i32>} : memref<16x32xf32, #tpu.memory_space<vmem>>, vector<16x32xf32>,
    } else {
    }
    return
  }
  func.func @transform_0(%arg0: i32, %arg1: i32, %arg2: i32) -> (i32, i32) {
    %c0_i32 = arith.constant 0 : i32
    return %arg0, %arg2 : i32, i32
  }
  func.func @transform_1(%arg0: i32, %arg1: i32, %arg2: i32) -> (i32, i32) {
    %c0_i32 = arith.constant 0 : i32
    return %arg2, %arg1 : i32, i32
  }
  func.func @transform_2(%arg0: i32, %arg1: i32, %arg2: i32) -> (i32, i32) {
    %c0_i32 = arith.constant 0 : i32
    %c0_i32_0 = arith.constant 0 : i32
    return %c0_i32, %arg1 : i32, i32
  }
  func.func @transform_3(%arg0: i32, %arg1: i32, %arg2: i32) -> (i32, i32) {
    %c0_i32 = arith.constant 0 : i32
    return %arg0, %arg1 : i32, i32
  }
}

</mosaic_0001>

<bundles_post_ra>
// kernel: tpu_custom_call.1
= control target key start
LH: loop header
LB: loop body
LE: loop exit
PB: predicated region body
PF: predicated region fallthrough
CT: control target
= control target key end

     0   :  { %8 = vsyncpa [#allocation4], 0  ;;  %s275_s0 = inlined_call_operand.hbm [shape: f32[16,32], index: 0, kind: input, shape index: {}]   ;;  %s276_s1 = inlined_call_operand.hbm [shape: f32[32,32], index: 1, kind: input, shape index: {}]   ;;  %s277_s2 = inlined_call_operand.vmem [shape: f32[1,32], index: 2, kind: input, shape index: {}]   ;;  %s278_s3 = inlined_call_operand.hbm [shape: f32[16,32], index: 3, kind: output, shape index: {}]  }
   0x1   :  { %9 = vsyncpa [#allocation7], 0 }
   0x2   :  { %10 = vsyncpa [#allocation5], 0  ;;  %s15_s14 = sshll.u32 %s275_s0, 4  ;;  %s220_s15 = smov [#allocation3]   ;;  %s16_s14 = int_to_ptr.hbm [resolvable:$true] %s15_s14 }
   0x3   :  { %s17_s16 = sshll.u32 %s220_s15, 4  ;;  %s28_s19 = sshll.u32 %s276_s1, 4  ;;  %s18_s16 = int_to_ptr.vmem [resolvable:$true] %s17_s16  ;;  %s29_s19 = int_to_ptr.hbm [resolvable:$true] %s28_s19 }
   0x4   :  { %s221_s20 = smov 128   ;;  %s222_s21 = smov 8  }
   0x5   :  { %23 = dma.hbm_to_vmem [thread:$0]  %s16_s14, 256, %s18_s16, [#allocation4], %s221_s20, %s221_s20, %s222_s21  }
   0x6   :  { %s223_s22 = smov [#allocation6]  }
   0x7   :  { %s30_s23 = sshll.u32 %s223_s22, 4  ;;  %s31_s23 = int_to_ptr.vmem [resolvable:$true] %s30_s23 }
   0x8   :  { %36 = dma.hbm_to_vmem [thread:$0]  %s29_s19, 512, %s31_s23, [#allocation7], %s221_s20, %s221_s20, %s222_s21  }
   0x9   :  { %214 = dma.done.wait [#allocation4], 256  }
   0xa   :  { %215 = vsyncadd [#allocation4], 4294967040 }
   0xb   :  { %216 = dma.done.wait [#allocation7], 512  }
   0xc   :  { %217 = vsyncadd [#allocation7], 4294966784  ;;  %vm51_vm0 = vcmask 261120   ;;  %v224_v0 = vmov 0.0   ;;  %v61_v1 = vld [vmem:[#allocation6 + $0x18] sm:$0xff]  ;;  %v60_v2 = vld [vmem:[#allocation6 + $0x10] sm:$0xff] }
   0xd   :  { %52 = vst.msk [vmem:[#allocation2] sm:$0xff] %vm51_vm0, %v224_v0  ;;  %81 = vmatpush.msra.mxu0 %v61_v1  ;;  %131 = vmatpush.msra.mxu1 %v61_v1  ;;  %v59_v3 = vld [vmem:[#allocation6 + $0x8] sm:$0xff]  ;;  %v58_v4 = vld [vmem:[#allocation6] sm:$0xff]  ;;  %v56_v5 = vld [vmem:[#allocation3] sm:$0xff]  ;;  %s225_s24 = smov [#allocation8]   ;;  %s115_s28 = sshll.u32 %s278_s3, 4  ;;  %s116_s28 = int_to_ptr.hbm [resolvable:$true] %s115_s28 }
   0xe   :  { %53 = vst.msk [vmem:[#allocation2 + $0x8] sm:$0xff] %vm51_vm0, %v224_v0  ;;  %v57_v6 = vld [vmem:[#allocation3 + $0x8] sm:$0xff]  ;;  %v141_v13 = vld [vmem:[%s277_s2] ss:$0 sm:$0xff]  ;;  %s113_s25 = sshll.u32 %s225_s24, 4  ;;  %s114_s25 = int_to_ptr.vmem [resolvable:$true] %s113_s25 }
   0xf   :  { %82 = vmatpush.msra.mxu0 %v60_v2  ;;  %132 = vmatpush.msra.mxu1 %v60_v2 }
  0x11   :  { %83 = vmatpush.msra.mxu0 %v59_v3  ;;  %133 = vmatpush.msra.mxu1 %v59_v3 }
  0x13   :  { %84 = vmatpush.msra.mxu0 %v58_v4  ;;  %134 = vmatpush.msra.mxu1 %v58_v4 }
  0x14   :  { %129 = vmatmul.msk.f32.vlgmr.msra.gmra.mxu0 %vm51_vm0, %v56_v5  ;;  %130 = vmatmul.msk.f32.vlgmr.msra.gmra.mxu1 %vm51_vm0, %v57_v6  ;;  %v54_v7 = vld [vmem:[#allocation2] sm:$0xff] }
  0x15   :  { %v55_v8 = vld [vmem:[#allocation2 + $0x8] sm:$0xff] }
  0x91   :  { %v86_v9 = vpop.f32.mrf.mxu0  ;;  %v89_v10 = vpop.f32.mrf.mxu1 }
  0x92   :  { %v92_v11 = vadd.f32 %v86_v9, %v54_v7  ;;  %v93_v12 = vadd.f32 %v89_v10, %v55_v8 }
  0x94   :  { %94 = vst.msk [vmem:[#allocation2] sm:$0xff] %vm51_vm0, %v92_v11 }
  0x95   :  { %95 = vst.msk [vmem:[#allocation2 + $0x8] sm:$0xff] %vm51_vm0, %v93_v12 }
  0x9b   :  { %v99_v14 = vld [vmem:[#allocation2] sm:$0xff] }
  0x9c   :  { %v100_v15 = vld [vmem:[#allocation2 + $0x8] sm:$0xff]  ;;  %v105_v16 = vadd.f32 %v141_v13, %v99_v14 }
  0x9d   :  { %v106_v17 = vadd.f32 %v141_v13, %v100_v15 }
  0x9e   :  { %107 = vst.msk [vmem:[#allocation8] sm:$0xff] %vm51_vm0, %v105_v16 }
  0x9f   :  { %108 = vst.msk [vmem:[#allocation8 + $0x8] sm:$0xff] %vm51_vm0, %v106_v17 }
  0xa0   :  { %121 = dma.vmem_to_hbm [thread:$0]  %s114_s25, 256, %s116_s28, [#allocation5], %s221_s20, %s221_s20, %s222_s21  }
  0xa1   :  { %218 = dma.done.wait [#allocation5], 256  }
  0xa2   :  { %219 = vsyncadd [#allocation5], 4294967040 }
  0xa3   :  { %126 = vsyncpa [#allocation4], 1 }
  0xa4   :  { %127 = vsyncpa [#allocation7], 1 }
  0xa5   :  { %128 = vsyncpa [#allocation5], 1 }

</bundles_post_ra>
